<compile_context>
chip_gen: v5e
topology: v5e:2x2
jax: 0.10.0
libtpu: 0.0.40
codegen_flags: <defaults>
</compile_context>

<pallas_src>
import jax
import jax.numpy as jnp
from jax import lax
from jax.experimental import pallas as pl
from jax.experimental.pallas import tpu as pltpu


def _round_up(x, m):
    return ((x + m - 1) // m) * m


def scaled_linear_kernel(scale_ref, x_ref, w_ref, b_ref, o_ref, acc_ref):
    # scale_ref: (1,1) f32 in SMEM
    # x_ref: (tm, tk)   w_ref: (tn, tk)  (nn.Linear layout tile: OUT x IN)
    # b_ref: (1, tn)    o_ref: (tm, tn)  acc_ref: (tm, tn) f32 VMEM scratch
    k = pl.program_id(2)

    @pl.when(k == 0)
    def _():
        acc_ref[...] = jnp.zeros_like(acc_ref)

    # (tm, tk) . (tn, tk) contracted over the last dims -> (tm, tn).
    # Weight is consumed directly in (OUT, IN) layout: no wrapper transpose.
    acc_ref[...] += lax.dot_general(
        x_ref[...],
        w_ref[...],
        dimension_numbers=(((1,), (1,)), ((), ())),
        preferred_element_type=jnp.float32,
        precision=lax.Precision.HIGHEST,  # match f32 nn.Linear accuracy
    )

    @pl.when(k == pl.num_programs(2) - 1)
    def _():
        scale = scale_ref[0, 0]
        o_ref[...] = (scale * (acc_ref[...] + b_ref[...])).astype(o_ref.dtype)


def scaled_linear(x, weight, bias, scale, *, tm=512, tn=512, tk=1024):
    B, IN = x.shape
    OUT, IN_w = weight.shape
    assert IN == IN_w, "weight must be (out_features, in_features)"

    itemsize = jnp.dtype(x.dtype).itemsize

    # Clamp tiles for small problems while respecting the (8, 128) constraint.
    tm = min(tm, _round_up(B, 8))
    tn = min(tn, _round_up(OUT, 128))
    tk = min(tk, _round_up(IN, 128))

    # Keep the double-buffered working set within a conservative budget so the
    # same tiling fits v7x (64 MiB physical / 32 MiB default scoped per TC).
    def _vmem_need(tm_, tn_, tk_):
        return (2 * (tm_ * tk_ + tn_ * tk_) * itemsize   # x + w tiles, 2-deep
                + 2 * tm_ * tn_ * itemsize               # output tiles, 2-deep
                + tm_ * tn_ * 4                          # f32 accumulator
                + 2 * tn_ * 4)                           # bias tiles

    VMEM_BUDGET = 24 << 20
    while _vmem_need(tm, tn, tk) > VMEM_BUDGET and tk > 512:
        tk = max(512, tk // 2)
    while _vmem_need(tm, tn, tk) > VMEM_BUDGET and tn > 256:
        tn = max(256, tn // 2)
    while _vmem_need(tm, tn, tk) > VMEM_BUDGET and tm > 256:
        tm = max(256, tm // 2)

    M_pad = _round_up(B, tm)
    N_pad = _round_up(OUT, tn)
    K_pad = _round_up(IN, tk)

    # Pad only when needed; weight keeps its (OUT, IN) layout (no transpose).
    x_p = x if (M_pad, K_pad) == (B, IN) else jnp.pad(
        x, ((0, M_pad - B), (0, K_pad - IN)))
    w_p = weight if (N_pad, K_pad) == (OUT, IN) else jnp.pad(
        weight, ((0, N_pad - OUT), (0, K_pad - IN)))
    b_p = bias if N_pad == OUT else jnp.pad(bias, (0, N_pad - OUT))
    b_p = b_p.reshape(1, N_pad)
    scale_arr = jnp.asarray(scale, dtype=jnp.float32).reshape(1, 1)

    g_m, g_n, g_k = M_pad // tm, N_pad // tn, K_pad // tk
    grid = (g_m, g_n, g_k)

    # Bytes include re-reads: x is streamed g_n times, weight g_m times.
    cost = pl.CostEstimate(
        flops=2 * M_pad * K_pad * N_pad,
        transcendentals=0,
        bytes_accessed=(itemsize * M_pad * K_pad * g_n
                        + itemsize * N_pad * K_pad * g_m
                        + itemsize * M_pad * N_pad),
    )

    out_p = pl.pallas_call(
        scaled_linear_kernel,
        out_shape=jax.ShapeDtypeStruct((M_pad, N_pad), x.dtype),
        grid_spec=pltpu.PrefetchScalarGridSpec(
            num_scalar_prefetch=0,
            grid=grid,
            in_specs=[
                pl.BlockSpec(memory_space=pltpu.SMEM),            # scale (1,1)
                pl.BlockSpec((tm, tk), lambda i, j, k: (i, k)),   # x tile
                pl.BlockSpec((tn, tk), lambda i, j, k: (j, k)),   # weight tile
                pl.BlockSpec((1, tn), lambda i, j, k: (0, j)),    # bias tile
            ],
            out_specs=pl.BlockSpec((tm, tn), lambda i, j, k: (i, j)),
            scratch_shapes=[pltpu.VMEM((tm, tn), jnp.float32)],
        ),
        compiler_params=pltpu.CompilerParams(
            dimension_semantics=("parallel", "parallel", "arbitrary"),
            vmem_limit_bytes=48 << 20,   # > v5e/v6e/v7x scoped defaults, < v7x physical
        ),
        cost_estimate=cost,
    )(scale_arr, x_p, w_p, b_p)

    return out_p[:B, :OUT]


if __name__ == "__main__":
    key = jax.random.PRNGKey(0)
    k_x, k_w, k_b, k_x2, k_w2, k_b2 = jax.random.split(key, 6)

    # Case 1: the module's own shapes (x = torch.rand(1, 16), out_features=32).
    B, IN, OUT = 1, 16, 32
    scale = 2.5
    x = jax.random.uniform(k_x, (B, IN), dtype=jnp.float32)
    weight = jax.random.normal(k_w, (OUT, IN), dtype=jnp.float32) * 0.1
    bias = jax.random.normal(k_b, (OUT,), dtype=jnp.float32) * 0.1

    out = scaled_linear(x, weight, bias, scale)
    jax.block_until_ready(out)
    ref = scale * (jnp.dot(x, weight.T, precision=lax.Precision.HIGHEST) + bias)
    assert out.shape == (B, OUT)
    assert jnp.allclose(out, ref, atol=1e-5, rtol=1e-5), "mismatch vs reference (case 1)"

    # Case 2: exercise N tiling, K accumulation and padding (grid = (1, 2, 2)).
    B2, IN2, OUT2 = 8, 2048, 768
    x2 = jax.random.uniform(k_x2, (B2, IN2), dtype=jnp.float32)
    weight2 = jax.random.normal(k_w2, (OUT2, IN2), dtype=jnp.float32) * 0.05
    bias2 = jax.random.normal(k_b2, (OUT2,), dtype=jnp.float32) * 0.1

    out2 = scaled_linear(x2, weight2, bias2, 0.75)
    jax.block_until_ready(out2)
    ref2 = 0.75 * (jnp.dot(x2, weight2.T, precision=lax.Precision.HIGHEST) + bias2)
    assert out2.shape == (B2, OUT2)
    assert jnp.allclose(out2, ref2, atol=1e-4, rtol=1e-5), "mismatch vs reference (case 2)"

    print("KERNEL_OK")
</pallas_src>

<mosaic_0001>
module attributes {stable_mosaic.version = 11 : i64} {
  func.func @scaled_linear_kernel(%arg0: i32, %arg1: i32, %arg2: i32, %arg3: memref<1x1xf32, #tpu.memory_space<smem>>, %arg4: memref<8x128xf32, #tpu.memory_space<vmem>>, %arg5: memref<128x128xf32, #tpu.memory_space<vmem>>, %arg6: memref<1x128xf32, #tpu.memory_space<vmem>>, %arg7: memref<8x128xf32, #tpu.memory_space<vmem>>, %arg8: memref<8x128xf32, #tpu.memory_space<vmem>>) attributes {dimension_semantics = [#tpu.dimension_semantics<parallel>, #tpu.dimension_semantics<parallel>, #tpu.dimension_semantics<arbitrary>], iteration_bounds = array<i64: 1, 1, 1>, scalar_prefetch = 0 : i64, scratch_operands = 1 : i64, tpu.core_type = #tpu.core_type<tc>, window_params = [{transform_indices = @transform_0, window_bounds = array<i64: 1, 1>}, {transform_indices = @transform_1, window_bounds = array<i64: 8, 128>}, {transform_indices = @transform_2, window_bounds = array<i64: 128, 128>}, {transform_indices = @transform_3, window_bounds = array<i64: 1, 128>}, {transform_indices = @transform_4, window_bounds = array<i64: 8, 128>}]} {
    %c0_i32 = arith.constant 0 : i32
    %0 = arith.cmpi eq, %arg2, %c0_i32 : i32
    %1 = arith.extui %0 : i1 to i32
    %c0_i32_0 = arith.constant 0 : i32
    %2 = arith.cmpi ne, %1, %c0_i32_0 : i32
    scf.if %2 {
      %cst_10 = arith.constant 0.000000e+00 : f32
      %12 = vector.broadcast %cst_10 : f32 to vector<8x128xf32>
      %c0_11 = arith.constant 0 : index
      %c0_12 = arith.constant 0 : index
      %13 = vector.load %arg8[%c0_11, %c0_12] : memref<8x128xf32, #tpu.memory_space<vmem>>, vector<8x128xf32>
      tpu.vector_store %arg8[%c0_11, %c0_12], %12 {strides = array<i32>} : memref<8x128xf32, #tpu.memory_space<vmem>>, vector<8x128xf32>,
    } else {
    }
    %c0 = arith.constant 0 : index
    %c0_1 = arith.constant 0 : index
    %3 = vector.load %arg8[%c0, %c0_1] : memref<8x128xf32, #tpu.memory_space<vmem>>, vector<8x128xf32>
    %c0_2 = arith.constant 0 : index
    %c0_3 = arith.constant 0 : index
    %4 = vector.load %arg4[%c0_2, %c0_3] : memref<8x128xf32, #tpu.memory_space<vmem>>, vector<8x128xf32>
    %c0_4 = arith.constant 0 : index
    %c0_5 = arith.constant 0 : index
    %5 = vector.load %arg5[%c0_4, %c0_5] : memref<128x128xf32, #tpu.memory_space<vmem>>, vector<128x128xf32>
    %cst = arith.constant dense<0.000000e+00> : vector<8x128xf32>
    %6 = tpu.matmul %4, %5, %cst {dimension_numbers = #tpu.dot_dimension_numbers<[1], [1], [0], [0], [0, 0, 1, 0], [], []>, precision = #tpu.contract_precision<fp32>} : vector<8x128xf32>, vector<128x128xf32>, vector<8x128xf32> -> vector<8x128xf32>
    %7 = arith.addf %3, %6 : vector<8x128xf32>
    %c0_6 = arith.constant 0 : index
    %c0_7 = arith.constant 0 : index
    %8 = vector.load %arg8[%c0_6, %c0_7] : memref<8x128xf32, #tpu.memory_space<vmem>>, vector<8x128xf32>
    tpu.vector_store %arg8[%c0_6, %c0_7], %7 {strides = array<i32>} : memref<8x128xf32, #tpu.memory_space<vmem>>, vector<8x128xf32>,
    %c0_i32_8 = arith.constant 0 : i32
    %9 = arith.cmpi eq, %arg2, %c0_i32_8 : i32
    %10 = arith.extui %9 : i1 to i32
    %c0_i32_9 = arith.constant 0 : i32
    %11 = arith.cmpi ne, %10, %c0_i32_9 : i32
    scf.if %11 {
      %c0_10 = arith.constant 0 : index
      %c0_11 = arith.constant 0 : index
      %12 = memref.load %arg3[%c0_10, %c0_11] : memref<1x1xf32, #tpu.memory_space<smem>>
      %c0_12 = arith.constant 0 : index
      %c0_13 = arith.constant 0 : index
      %13 = vector.load %arg8[%c0_12, %c0_13] : memref<8x128xf32, #tpu.memory_space<vmem>>, vector<8x128xf32>
      %c0_14 = arith.constant 0 : index
      %c0_15 = arith.constant 0 : index
      %14 = vector.load %arg6[%c0_14, %c0_15] : memref<1x128xf32, #tpu.memory_space<vmem>>, vector<1x128xf32>
      %15 = vector.broadcast %14 : vector<1x128xf32> to vector<8x128xf32>
      %16 = arith.addf %13, %15 : vector<8x128xf32>
      %17 = vector.broadcast %12 : f32 to vector<8x128xf32>
      %18 = arith.mulf %17, %16 : vector<8x128xf32>
      %c0_16 = arith.constant 0 : index
      %c0_17 = arith.constant 0 : index
      %19 = vector.load %arg7[%c0_16, %c0_17] : memref<8x128xf32, #tpu.memory_space<vmem>>, vector<8x128xf32>
      tpu.vector_store %arg7[%c0_16, %c0_17], %18 {strides = array<i32>} : memref<8x128xf32, #tpu.memory_space<vmem>>, vector<8x128xf32>,
    } else {
    }
    return
  }
  func.func @transform_0(%arg0: i32, %arg1: i32, %arg2: i32) -> (i32, i32) {
    %c0_i32 = arith.constant 0 : i32
    %c0_i32_0 = arith.constant 0 : i32
    %c0_i32_1 = arith.constant 0 : i32
    return %c0_i32, %c0_i32_0 : i32, i32
  }
  func.func @transform_1(%arg0: i32, %arg1: i32, %arg2: i32) -> (i32, i32) {
    %c0_i32 = arith.constant 0 : i32
    return %arg0, %arg2 : i32, i32
  }
  func.func @transform_2(%arg0: i32, %arg1: i32, %arg2: i32) -> (i32, i32) {
    %c0_i32 = arith.constant 0 : i32
    return %arg1, %arg2 : i32, i32
  }
  func.func @transform_3(%arg0: i32, %arg1: i32, %arg2: i32) -> (i32, i32) {
    %c0_i32 = arith.constant 0 : i32
    %c0_i32_0 = arith.constant 0 : i32
    return %c0_i32, %arg1 : i32, i32
  }
  func.func @transform_4(%arg0: i32, %arg1: i32, %arg2: i32) -> (i32, i32) {
    %c0_i32 = arith.constant 0 : i32
    return %arg0, %arg1 : i32, i32
  }
}

</mosaic_0001>

<bundles_post_ra>
// kernel: tpu_custom_call.1
= control target key start
LH: loop header
LB: loop body
LE: loop exit
PB: predicated region body
PF: predicated region fallthrough
CT: control target
= control target key end

     0   :  { %10 = vsyncpa [#allocation5], 0  ;;  %s802_s0 = inlined_call_operand.<no memory space> [shape: f32[1,1], index: 0, kind: input, shape index: {}]   ;;  %s803_s1 = inlined_call_operand.hbm [shape: f32[8,128], index: 1, kind: input, shape index: {}]   ;;  %s804_s2 = inlined_call_operand.hbm [shape: f32[128,128], index: 2, kind: input, shape index: {}]   ;;  %s805_s3 = inlined_call_operand.vmem [shape: f32[1,128], index: 3, kind: input, shape index: {}]   ;;  %s806_s4 = inlined_call_operand.hbm [shape: f32[8,128], index: 4, kind: output, shape index: {}]  }
   0x1   :  { %11 = vsyncpa [#allocation8], 0 }
   0x2   :  { %12 = vsyncpa [#allocation6], 0  ;;  %s20_s17 = sshll.u32 %s803_s1, 4  ;;  %s530_s18 = smov [#allocation4]   ;;  %s21_s17 = int_to_ptr.hbm [resolvable:$true] %s20_s17 }
   0x3   :  { %s22_s19 = sshll.u32 %s530_s18, 4  ;;  %s30_s22 = sshll.u32 %s804_s2, 4  ;;  %s23_s19 = int_to_ptr.vmem [resolvable:$true] %s22_s19  ;;  %s31_s22 = int_to_ptr.hbm [resolvable:$true] %s30_s22 }
   0x4   :  { %25 = dma.hbm_to_vmem [thread:$0]  %s21_s17, 128, %s23_s19, [#allocation5]  }
   0x5   :  { %s531_s23 = smov [#allocation7]   ;;  %s532_s25 = smov 128  }
   0x6   :  { %s32_s24 = sshll.u32 %s531_s23, 4  ;;  %s533_s26 = smov 8   ;;  %s33_s24 = int_to_ptr.vmem [resolvable:$true] %s32_s24 }
   0x7   :  { %38 = dma.hbm_to_vmem [thread:$0]  %s31_s22, 2048, %s33_s24, [#allocation8], %s532_s25, %s532_s25, %s533_s26  }
   0x8   :  { %524 = dma.done.wait [#allocation5], 128  }
   0x9   :  { %525 = vsyncadd [#allocation5], 4294967168 }
   0xa   :  { %526 = dma.done.wait [#allocation8], 2048  }
   0xb   :  { %527 = vsyncadd [#allocation8], 4294965248  ;;  %v71_v0 = vld [vmem:[#allocation7 + $0x78] sm:$0xff]  ;;  %v70_v1 = vld [vmem:[#allocation7 + $0x70] sm:$0xff]  ;;  %s534_s29 = smov [#allocation9]   ;;  %s435_s7 = sshll.u32 %s806_s4, 4  ;;  %s436_s7 = int_to_ptr.hbm [resolvable:$true] %s435_s7 }
   0xc   :  { %v69_v2 = vld [vmem:[#allocation7 + $0x68] sm:$0xff]  ;;  %v566_v3 = vand.u32 4294901760, %v71_v0  ;;  %v568_v4 = vand.u32 4294901760, %v70_v1  ;;  %v68_v6 = vld [vmem:[#allocation7 + $0x60] sm:$0xff]  ;;  %v67_v11 = vld [vmem:[#allocation7 + $0x58] sm:$0xff]  ;;  %s433_s30 = sshll.u32 %s534_s29, 4  ;;  %s434_s30 = int_to_ptr.vmem [resolvable:$true] %s433_s30 }
   0xd   :  { %v570_v5 = vand.u32 4294901760, %v69_v2  ;;  %v579_v9 = vand.u32 4294901760, %v68_v6  ;;  %v588_v14 = vand.u32 4294901760, %v67_v11  ;;  %v66_v19 = vld [vmem:[#allocation7 + $0x50] sm:$0xff]  ;;  %v65_v26 = vld [vmem:[#allocation7 + $0x48] sm:$0xff]  ;;  %v64_v32 = vld [vmem:[#allocation7 + $0x40] sm:$0xff] }
   0xe   :  { %73 = vmatpush.xpose.msra.mxu0 %v566_v3  ;;  %v574_v7 = vsub.f32 %v71_v0, %v566_v3  ;;  %v577_v8 = vsub.f32 %v70_v1, %v568_v4  ;;  %269 = vmatpush.xpose.msra.mxu3 %v566_v3  ;;  %v603_v21 = vand.u32 4294901760, %v66_v19  ;;  %v615_v27 = vand.u32 4294901760, %v65_v26  ;;  %v63_v38 = vld [vmem:[#allocation7 + $0x38] sm:$0xff]  ;;  %v62_v44 = vld [vmem:[#allocation7 + $0x30] sm:$0xff]  ;;  %v61_v50 = vld [vmem:[#allocation7 + $0x28] sm:$0xff] }
   0xf   :  { %v582_v10 = vsub.f32 %v69_v2, %v570_v5  ;;  %v599_v18 = vsub.f32 %v68_v6, %v579_v9  ;;  %v611_v25 = vsub.f32 %v67_v11, %v588_v14  ;;  %v635_v37 = vand.u32 4294901760, %v64_v32  ;;  %v60_v56 = vld [vmem:[#allocation7 + $0x20] sm:$0xff]  ;;  %v59_v62 = vld [vmem:[#allocation7 + $0x18] sm:$0xff]  ;;  %v58_v11 = vld [vmem:[#allocation7 + $0x10] sm:$0xff] }
  0x10   :  { %v115_v12 = vand.u32 4294901760, %v574_v7  ;;  %v121_v13 = vand.u32 4294901760, %v577_v8  ;;  %216 = vmatpush.xpose.msra.mxu2 %v574_v7  ;;  %v623_v31 = vsub.f32 %v66_v19, %v603_v21  ;;  %v628_v33 = vsub.f32 %v65_v26, %v615_v27 }
  0x11   :  { %v127_v17 = vand.u32 4294901760, %v582_v10  ;;  %v133_v24 = vand.u32 4294901760, %v599_v18  ;;  %v139_v30 = vand.u32 4294901760, %v611_v25  ;;  %v644_v42 = vand.u32 4294901760, %v63_v38 }
  0x12   :  { %75 = vmatpush.xpose.msra.mxu0 %v568_v4  ;;  %v116_v15 = vsub.f32 %v574_v7, %v115_v12  ;;  %v122_v16 = vsub.f32 %v577_v8, %v121_v13  ;;  %271 = vmatpush.xpose.msra.mxu3 %v568_v4  ;;  %v145_v36 = vand.u32 4294901760, %v623_v31  ;;  %v151_v39 = vand.u32 4294901760, %v628_v33  ;;  %v55_v7 = vld [vmem:[#allocation4] sm:$0xff] }
  0x13   :  { %v128_v23 = vsub.f32 %v582_v10, %v127_v17  ;;  %v134_v29 = vsub.f32 %v599_v18, %v133_v24  ;;  %v140_v35 = vsub.f32 %v611_v25, %v139_v30  ;;  %v647_v43 = vsub.f32 %v64_v32, %v635_v37 }
  0x14   :  { %v117_v20 = vand.u32 4294901760, %v116_v15  ;;  %219 = vmatpush.xpose.msra.mxu2 %v577_v8  ;;  %v123_v22 = vand.u32 4294901760, %v122_v16  ;;  %v146_v41 = vsub.f32 %v623_v31, %v145_v36  ;;  %v152_v45 = vsub.f32 %v628_v33, %v151_v39 }
  0x15   :  { %v129_v28 = vand.u32 4294901760, %v128_v23  ;;  %v135_v34 = vand.u32 4294901760, %v134_v29  ;;  %v141_v40 = vand.u32 4294901760, %v140_v35  ;;  %v157_v47 = vand.u32 4294901760, %v647_v43  ;;  %v57_v23 = vld [vmem:[#allocation7 + $0x8] sm:$0xff]  ;;  %v56_v35 = vld [vmem:[#allocation7] sm:$0xff] }
  0x16   :  { %118 = vmatpush.xpose.msra.mxu1 %v117_v20  ;;  %77 = vmatpush.xpose.msra.mxu0 %v570_v5  ;;  %v147_v46 = vand.u32 4294901760, %v146_v41  ;;  %v656_v48 = vand.u32 4294901760, %v62_v44  ;;  %v659_v49 = vsub.f32 %v63_v38, %v644_v42  ;;  %v153_v51 = vand.u32 4294901760, %v152_v45 }
  0x17   :  { %273 = vmatpush.xpose.msra.mxu3 %v570_v5  ;;  %v158_v52 = vsub.f32 %v647_v43, %v157_v47  ;;  %v668_v54 = vand.u32 4294901760, %v61_v50  ;;  %v675_v57 = vand.u32 4294901760, %v60_v56  ;;  %v695_v6 = vand.u32 4294901760, %v59_v62 }
  0x18   :  { %222 = vmatpush.xpose.msra.mxu2 %v582_v10  ;;  %v163_v53 = vand.u32 4294901760, %v659_v49  ;;  %v671_v55 = vsub.f32 %v62_v44, %v656_v48  ;;  %v704_v20 = vand.u32 4294901760, %v58_v11  ;;  %v716_v32 = vand.u32 4294901760, %v57_v23 }
  0x19   :  { %v159_v58 = vand.u32 4294901760, %v158_v52  ;;  %v683_v61 = vsub.f32 %v61_v50, %v668_v54  ;;  %v688_v63 = vsub.f32 %v60_v56, %v675_v57  ;;  %v728_v44 = vand.u32 4294901760, %v56_v35 }
  0x1a   :  { %124 = vmatpush.xpose.msra.mxu1 %v123_v22  ;;  %79 = vmatpush.xpose.msra.mxu0 %v579_v9  ;;  %v164_v59 = vsub.f32 %v659_v49, %v163_v53  ;;  %v169_v60 = vand.u32 4294901760, %v671_v55  ;;  %v707_v22 = vsub.f32 %v59_v62, %v695_v6  ;;  %v731_v45 = vsub.f32 %v57_v23, %v716_v32 }
  0x1b   :  { %275 = vmatpush.xpose.msra.mxu3 %v579_v9  ;;  %v175_v2 = vand.u32 4294901760, %v683_v61  ;;  %v181_v15 = vand.u32 4294901760, %v688_v63  ;;  %v204_v52 = vsub.f32 %v56_v35, %v728_v44 }
  0x1c   :  { %225 = vmatpush.xpose.msra.mxu2 %v599_v18  ;;  %v165_v0 = vand.u32 4294901760, %v164_v59  ;;  %v170_v1 = vsub.f32 %v671_v55, %v169_v60  ;;  %v187_v29 = vand.u32 4294901760, %v707_v22 }
  0x1d   :  { %v176_v19 = vsub.f32 %v683_v61, %v175_v2  ;;  %v182_v26 = vsub.f32 %v688_v63, %v181_v15  ;;  %v205_v59 = vand.u32 4294901760, %v204_v52 }
  0x1e   :  { %130 = vmatpush.xpose.msra.mxu1 %v129_v28  ;;  %81 = vmatpush.xpose.msra.mxu0 %v588_v14  ;;  %v171_v16 = vand.u32 4294901760, %v170_v1 }
  0x1f   :  { %277 = vmatpush.xpose.msra.mxu3 %v588_v14  ;;  %v177_v28 = vand.u32 4294901760, %v176_v19  ;;  %v183_v38 = vand.u32 4294901760, %v182_v26 }
  0x20   :  { %228 = vmatpush.xpose.msra.mxu2 %v611_v25 }
  0x22   :  { %136 = vmatpush.xpose.msra.mxu1 %v135_v34  ;;  %83 = vmatpush.xpose.msra.mxu0 %v603_v21  ;;  %v719_v34 = vsub.f32 %v58_v11, %v704_v20 }
  0x23   :  { %279 = vmatpush.xpose.msra.mxu3 %v603_v21 }
  0x24   :  { %231 = vmatpush.xpose.msra.mxu2 %v623_v31  ;;  %v193_v41 = vand.u32 4294901760, %v719_v34 }
  0x26   :  { %142 = vmatpush.xpose.msra.mxu1 %v141_v40  ;;  %85 = vmatpush.xpose.msra.mxu0 %v615_v27  ;;  %v188_v40 = vsub.f32 %v707_v22, %v187_v29  ;;  %v194_v50 = vsub.f32 %v719_v34, %v193_v41 }
  0x27   :  { %281 = vmatpush.xpose.msra.mxu3 %v615_v27 }
  0x28   :  { %234 = vmatpush.xpose.msra.mxu2 %v628_v33  ;;  %v195_v56 = vand.u32 4294901760, %v194_v50  ;;  %v425_v33 = vstv %s802_s0 }
  0x2a   :  { %148 = vmatpush.xpose.msra.mxu1 %v147_v46  ;;  %87 = vmatpush.xpose.msra.mxu0 %v635_v37  ;;  %v189_v46 = vand.u32 4294901760, %v188_v40 }
  0x2b   :  { %283 = vmatpush.xpose.msra.mxu3 %v635_v37 }
  0x2c   :  { %237 = vmatpush.xpose.msra.mxu2 %v647_v43 }
  0x2e   :  { %154 = vmatpush.xpose.msra.mxu1 %v153_v51  ;;  %89 = vmatpush.xpose.msra.mxu0 %v644_v42  ;;  %v199_v51 = vand.u32 4294901760, %v731_v45 }
  0x2f   :  { %285 = vmatpush.xpose.msra.mxu3 %v644_v42 }
  0x30   :  { %240 = vmatpush.xpose.msra.mxu2 %v659_v49 }
  0x32   :  { %160 = vmatpush.xpose.msra.mxu1 %v159_v58  ;;  %91 = vmatpush.xpose.msra.mxu0 %v656_v48  ;;  %v200_v58 = vsub.f32 %v731_v45, %v199_v51 }
  0x33   :  { %287 = vmatpush.xpose.msra.mxu3 %v656_v48 }
  0x34   :  { %243 = vmatpush.xpose.msra.mxu2 %v671_v55  ;;  %v201_v62 = vand.u32 4294901760, %v200_v58 }
  0x36   :  { %166 = vmatpush.xpose.msra.mxu1 %v165_v0  ;;  %93 = vmatpush.xpose.msra.mxu0 %v668_v54  ;;  %v206_v0 = vsub.f32 %v204_v52, %v205_v59 }
  0x37   :  { %289 = vmatpush.xpose.msra.mxu3 %v668_v54 }
  0x38   :  { %246 = vmatpush.xpose.msra.mxu2 %v683_v61  ;;  %v207_v1 = vand.u32 4294901760, %v206_v0 }
  0x3a   :  { %172 = vmatpush.xpose.msra.mxu1 %v171_v16  ;;  %95 = vmatpush.xpose.msra.mxu0 %v675_v57 }
  0x3b   :  { %291 = vmatpush.xpose.msra.mxu3 %v675_v57 }
  0x3c   :  { %249 = vmatpush.xpose.msra.mxu2 %v688_v63 }
  0x3e   :  { %178 = vmatpush.xpose.msra.mxu1 %v177_v28  ;;  %97 = vmatpush.xpose.msra.mxu0 %v695_v6 }
  0x3f   :  { %293 = vmatpush.xpose.msra.mxu3 %v695_v6 }
  0x40   :  { %252 = vmatpush.xpose.msra.mxu2 %v707_v22 }
  0x42   :  { %184 = vmatpush.xpose.msra.mxu1 %v183_v38  ;;  %99 = vmatpush.xpose.msra.mxu0 %v704_v20 }
  0x43   :  { %295 = vmatpush.xpose.msra.mxu3 %v704_v20 }
  0x44   :  { %255 = vmatpush.xpose.msra.mxu2 %v719_v34 }
  0x46   :  { %190 = vmatpush.xpose.msra.mxu1 %v189_v46  ;;  %101 = vmatpush.xpose.msra.mxu0 %v716_v32 }
  0x47   :  { %297 = vmatpush.xpose.msra.mxu3 %v716_v32 }
  0x48   :  { %258 = vmatpush.xpose.msra.mxu2 %v731_v45 }
  0x4a   :  { %196 = vmatpush.xpose.msra.mxu1 %v195_v56  ;;  %103 = vmatpush.xpose.msra.mxu0 %v728_v44 }
  0x4b   :  { %299 = vmatpush.xpose.msra.mxu3 %v728_v44 }
  0x4c   :  { %261 = vmatpush.xpose.msra.mxu2 %v204_v52 }
  0x4e   :  { %310 = vmatpush.xpose.msrb.mxu0 %v115_v12  ;;  %202 = vmatpush.xpose.msra.mxu1 %v201_v62  ;;  %v104_v12 = vand.u32 4294901760, %v55_v7 }
  0x50   :  { %v105_v8 = vsub.f32 %v55_v7, %v104_v12 }
  0x52   :  { %314 = vmatpush.xpose.msrb.mxu0 %v121_v13  ;;  %208 = vmatpush.xpose.msra.mxu1 %v207_v1 }
  0x53   :  { %264 = vmatmul.f32.vlgmr.msra.gmra.mxu2 %v105_v8 }
  0x55   :  { %210 = vmatmul.f32.vlgmr.msra.gmra.mxu1 %v104_v12 }
  0x56   :  { %377 = vmatpush.xpose.msrb.mxu1 %v566_v3  ;;  %318 = vmatpush.xpose.msrb.mxu0 %v127_v17  ;;  %v106_v3 = vand.u32 4294901760, %v105_v8 }
  0x58   :  { %303 = vmatmul.f32.vlgmr.msra.gmra.mxu3 %v106_v3 }
  0x5a   :  { %379 = vmatpush.xpose.msrb.mxu1 %v568_v4  ;;  %322 = vmatpush.xpose.msrb.mxu0 %v133_v24  ;;  %v107_v4 = vsub.f32 %v105_v8, %v106_v3 }
  0x5e   :  { %381 = vmatpush.xpose.msrb.mxu1 %v570_v5  ;;  %326 = vmatpush.xpose.msrb.mxu0 %v139_v30  ;;  %v108_v5 = vand.u32 4294901760, %v107_v4 }
  0x60   :  { %109 = vmatmul.f32.vlgmr.msra.gmra.mxu0 %v108_v5 }
  0x62   :  { %383 = vmatpush.xpose.msrb.mxu1 %v579_v9  ;;  %330 = vmatpush.xpose.msrb.mxu0 %v145_v36 }
  0x66   :  { %385 = vmatpush.xpose.msrb.mxu1 %v588_v14  ;;  %334 = vmatpush.xpose.msrb.mxu0 %v151_v39 }
  0x6a   :  { %387 = vmatpush.xpose.msrb.mxu1 %v603_v21  ;;  %338 = vmatpush.xpose.msrb.mxu0 %v157_v47 }
  0x6e   :  { %389 = vmatpush.xpose.msrb.mxu1 %v615_v27  ;;  %342 = vmatpush.xpose.msrb.mxu0 %v163_v53  ;;  %v451_v27 = vld [vmem:[%s805_s3] ss:$0 sm:$0xff] }
  0x72   :  { %391 = vmatpush.xpose.msrb.mxu1 %v635_v37  ;;  %346 = vmatpush.xpose.msrb.mxu0 %v169_v60 }
  0x76   :  { %393 = vmatpush.xpose.msrb.mxu1 %v644_v42  ;;  %350 = vmatpush.xpose.msrb.mxu0 %v175_v2 }
  0x7a   :  { %395 = vmatpush.xpose.msrb.mxu1 %v656_v48  ;;  %354 = vmatpush.xpose.msrb.mxu0 %v181_v15 }
  0x7e   :  { %397 = vmatpush.xpose.msrb.mxu1 %v668_v54  ;;  %358 = vmatpush.xpose.msrb.mxu0 %v187_v29 }
  0x82   :  { %399 = vmatpush.xpose.msrb.mxu1 %v675_v57  ;;  %362 = vmatpush.xpose.msrb.mxu0 %v193_v41 }
  0x86   :  { %401 = vmatpush.xpose.msrb.mxu1 %v695_v6  ;;  %366 = vmatpush.xpose.msrb.mxu0 %v199_v51 }
  0x8a   :  { %403 = vmatpush.xpose.msrb.mxu1 %v704_v20  ;;  %370 = vmatpush.xpose.msrb.mxu0 %v205_v59 }
  0x8d   :  { %372 = vmatmul.f32.vlgmr.msrb.gmra.mxu0 %v104_v12 }
  0x8e   :  { %405 = vmatpush.xpose.msrb.mxu1 %v716_v32 }
  0x92   :  { %407 = vmatpush.xpose.msrb.mxu1 %v728_v44 }
  0x95   :  { %409 = vmatmul.f32.vlgmr.msrb.gmra.mxu1 %v104_v12 }
  0xd2   :  { %v211_v9 = vpop.f32.mrf.mxu1 }
  0xd6   :  { %v265_v14 = vpop.f32.mrf.mxu2 }
  0xdb   :  { %v304_v18 = vpop.f32.mrf.mxu3 }
  0xdd   :  { %v110_v10 = vpop.f32.mrf.mxu0 }
  0xde   :  { %v212_v13 = vadd.f32 %v211_v9, %v110_v10 }
  0xe0   :  { %v266_v17 = vadd.f32 %v265_v14, %v212_v13 }
  0xe2   :  { %v305_v21 = vadd.f32 %v304_v18, %v266_v17 }
 0x10a   :  { %v373_v24 = vpop.f32.mrf.mxu0 }
 0x10b   :  { %v374_v25 = vadd.f32 %v373_v24, %v305_v21 }
 0x112   :  { %v410_v30 = vpop.f32.mrf.mxu1 }
 0x113   :  { %v411_v31 = vadd.f32 %v410_v30, %v374_v25 }
 0x115   :  { %v424_v36 = vadd.f32 %v451_v27, %v411_v31 }
 0x117   :  { %v426_v37 = vmul.f32 %v425_v33, %v424_v36 }
 0x119   :  { %427 = vst [vmem:[#allocation9] sm:$0xff] %v426_v37 }
 0x11a   :  { %438 = dma.vmem_to_hbm [thread:$0]  %s434_s30, 128, %s436_s7, [#allocation6]  }
 0x11b   :  { %528 = dma.done.wait [#allocation6], 128  }
 0x11c   :  { %529 = vsyncadd [#allocation6], 4294967168 }
 0x11d   :  { %443 = vsyncpa [#allocation5], 1 }
 0x11e   :  { %444 = vsyncpa [#allocation8], 1 }
 0x11f   :  { %445 = vsyncpa [#allocation6], 1 }

</bundles_post_ra>
